<compile_context>
chip_gen: v6e
topology: v6e:2x2x1
jax: 0.10.0
libtpu: 0.0.40
codegen_flags: <defaults>
</compile_context>

<pallas_src>
import functools
import math

import jax
import jax.numpy as jnp
import numpy as np
from jax.experimental import pallas as pl
from jax.experimental.pallas import tpu as pltpu

_MASK_VALUE = float(jnp.finfo(jnp.float32).min)   # == torch.nan_to_num(-inf)
_VMEM_LIMIT = 32 * 1024 * 1024                    # safe on v5e/v6e/v7x


# --------------------------- Kernel 1: per-head QKV projection ---------------------------
def _qkv_proj_kernel(x_ref, wq_ref, wk_ref, wv_ref, bq_ref, bk_ref, bv_ref,
                     q_ref, k_ref, v_ref):
    x = x_ref[0].astype(jnp.bfloat16)                                  # (tq, C)

    def proj(w_ref, b_ref):
        r = jnp.dot(x, w_ref[0], preferred_element_type=jnp.float32)  # (tq, hd) f32
        return (r + b_ref[0]).astype(jnp.bfloat16)

    q_ref[0, 0] = proj(wq_ref, bq_ref)   # scale already folded into wq / bq
    k_ref[0, 0] = proj(wk_ref, bk_ref)
    v_ref[0, 0] = proj(wv_ref, bv_ref)


# --------------------------- Kernel 2: flash attention core ---------------------------
def _flash_attn_kernel(lens_ref, q_ref, k_ref, v_ref, o_ref,
                       m_sc, l_sc, acc_sc, *, tq, tk):
    b = pl.program_id(0)
    qt = pl.program_id(2)
    kt = pl.program_id(3)
    nkv = pl.num_programs(3)

    @pl.when(kt == 0)
    def _init():
        m_sc[...] = jnp.full_like(m_sc, _MASK_VALUE)
        l_sc[...] = jnp.zeros_like(l_sc)
        acc_sc[...] = jnp.zeros_like(acc_sc)

    seq_len = lens_ref[b]
    q_start = qt * tq
    kv_start = kt * tk
    # Skip kv tiles entirely above the causal diagonal or entirely in padding.
    needed = jnp.logical_and(kv_start <= q_start + (tq - 1), kv_start < seq_len)

    @pl.when(needed)
    def _update():
        q = q_ref[0, 0]                                                # (tq, hd) bf16
        k = k_ref[0, 0]                                                # (tk, hd) bf16
        v = v_ref[0, 0]                                                # (tk, hd) bf16
        s = jax.lax.dot_general(q, k, (((1,), (1,)), ((), ())),
                                preferred_element_type=jnp.float32)    # (tq, tk) f32

        row = q_start + jax.lax.broadcasted_iota(jnp.int32, (tq, tk), 0)
        col = kv_start + jax.lax.broadcasted_iota(jnp.int32, (tq, tk), 1)
        keep = jnp.logical_and(col <= row, col < seq_len)
        s = jnp.where(keep, s, _MASK_VALUE)

        m_prev = m_sc[...]                                             # (tq, 1) f32
        m_new = jnp.maximum(m_prev, jnp.max(s, axis=-1, keepdims=True))
        alpha = jnp.exp(m_prev - m_new)
        p = jnp.exp(s - m_new)                                         # (tq, tk) f32
        l_sc[...] = alpha * l_sc[...] + jnp.sum(p, axis=-1, keepdims=True)
        acc_sc[...] = alpha * acc_sc[...] + jnp.dot(
            p.astype(jnp.bfloat16), v, preferred_element_type=jnp.float32)
        m_sc[...] = m_new

    @pl.when(kt == nkv - 1)
    def _finalize():
        inv_l = pl.reciprocal(l_sc[...], approx=True)
        o_ref[0, 0] = (acc_sc[...] * inv_l).astype(o_ref.dtype)


# --------------------------- Kernel 3: output projection (head reduction) ----------------
def _out_proj_kernel(y_ref, w_ref, b_ref, o_ref, acc_ref):
    h = pl.program_id(2)

    @pl.when(h == 0)
    def _init():
        acc_ref[...] = jnp.zeros_like(acc_ref)

    acc_ref[...] += jnp.dot(y_ref[0, 0], w_ref[0],
                            preferred_element_type=jnp.float32)        # (tq, C) f32

    @pl.when(h == pl.num_programs(2) - 1)
    def _finalize():
        o_ref[0] = (acc_ref[...] + b_ref[...]).astype(o_ref.dtype)


# ----------------------------------- wrapper -----------------------------------
def _pick_tile(t, target=128):
    if t <= target:
        return t
    tile = target
    while tile >= 8 and t % tile != 0:
        tile //= 2
    return tile if tile >= 8 else t


def key_lengths_from_pad_mask(pad_mask):
    """Right-padding key mask (B,T,T) or (B,1,T,T), 1=keep/0=pad -> per-batch lengths."""
    if pad_mask.ndim == 4:
        pad_mask = pad_mask[:, 0]
    return jnp.sum(pad_mask[:, 0, :] != 0.0, axis=-1).astype(jnp.int32)


def causal_self_attention(x, key_lens, w_attn, b_attn, w_proj, b_proj, n_head,
                          *, q_tile=None, kv_tile=None):
    """x: (B,T,C) f32; key_lens: (B,) int; weights stored (in,out) so y = x @ W + b."""
    B, T, C = x.shape
    assert C % n_head == 0
    hd = C // n_head
    tq = q_tile or _pick_tile(T)
    tk = kv_tile or _pick_tile(T)
    assert T % tq == 0 and T % tk == 0
    scale = 1.0 / math.sqrt(hd)

    # ---- weight prep (wrapper-side, once): head-major bf16 weights, scale folded into Q ----
    w = w_attn.reshape(C, 3, n_head, hd)                      # (C, 3, H, hd)
    b = b_attn.reshape(3, n_head, 1, hd)                      # (3, H, 1, hd)
    w_q = (jnp.transpose(w[:, 0], (1, 0, 2)) * scale).astype(jnp.bfloat16)   # (H, C, hd)
    w_k = jnp.transpose(w[:, 1], (1, 0, 2)).astype(jnp.bfloat16)
    w_v = jnp.transpose(w[:, 2], (1, 0, 2)).astype(jnp.bfloat16)
    b_q = (b[0] * scale).astype(jnp.float32)                  # (H, 1, hd)
    b_k = b[1].astype(jnp.float32)
    b_v = b[2].astype(jnp.float32)
    w_o = w_proj.reshape(n_head, hd, C).astype(jnp.bfloat16)  # (H, hd, C)
    b_o = b_proj.reshape(1, C).astype(jnp.float32)
    key_lens = key_lens.astype(jnp.int32)

    qkv_shape = jax.ShapeDtypeStruct((B, n_head, T, hd), jnp.bfloat16)

    # ---- 1) per-head QKV projection ----
    q, k, v = pl.pallas_call(
        _qkv_proj_kernel,
        out_shape=(qkv_shape, qkv_shape, qkv_shape),
        grid=(B, T // tq, n_head),
        in_specs=[
            pl.BlockSpec((1, tq, C), lambda b_, t_, h_: (b_, t_, 0)),
            pl.BlockSpec((1, C, hd), lambda b_, t_, h_: (h_, 0, 0)),
            pl.BlockSpec((1, C, hd), lambda b_, t_, h_: (h_, 0, 0)),
            pl.BlockSpec((1, C, hd), lambda b_, t_, h_: (h_, 0, 0)),
            pl.BlockSpec((1, 1, hd), lambda b_, t_, h_: (h_, 0, 0)),
            pl.BlockSpec((1, 1, hd), lambda b_, t_, h_: (h_, 0, 0)),
            pl.BlockSpec((1, 1, hd), lambda b_, t_, h_: (h_, 0, 0)),
        ],
        out_specs=(
            pl.BlockSpec((1, 1, tq, hd), lambda b_, t_, h_: (b_, h_, t_, 0)),
            pl.BlockSpec((1, 1, tq, hd), lambda b_, t_, h_: (b_, h_, t_, 0)),
            pl.BlockSpec((1, 1, tq, hd), lambda b_, t_, h_: (b_, h_, t_, 0)),
        ),
        compiler_params=pltpu.CompilerParams(
            dimension_semantics=("parallel", "parallel", "parallel"),
            vmem_limit_bytes=_VMEM_LIMIT),
        cost_estimate=pl.CostEstimate(
            flops=2 * B * T * C * 3 * C,
            transcendentals=0,
            bytes_accessed=B * T * C * 4 + 3 * C * C * 2 + 3 * C * 4 + 3 * B * T * C * 2),
    )(x, w_q, w_k, w_v, b_q, b_k, b_v)

    # ---- 2) flash attention with online softmax; lengths scalar-prefetched to SMEM ----
    flash_kern = functools.partial(_flash_attn_kernel, tq=tq, tk=tk)
    y = pl.pallas_call(
        flash_kern,
        out_shape=jax.ShapeDtypeStruct((B, n_head, T, hd), jnp.bfloat16),
        grid_spec=pltpu.PrefetchScalarGridSpec(
            num_scalar_prefetch=1,
            grid=(B, n_head, T // tq, T // tk),
            in_specs=[
                pl.BlockSpec((1, 1, tq, hd), lambda b_, h_, qi, ki, lens: (b_, h_, qi, 0)),
                pl.BlockSpec((1, 1, tk, hd), lambda b_, h_, qi, ki, lens: (b_, h_, ki, 0)),
                pl.BlockSpec((1, 1, tk, hd), lambda b_, h_, qi, ki, lens: (b_, h_, ki, 0)),
            ],
            out_specs=pl.BlockSpec((1, 1, tq, hd),
                                   lambda b_, h_, qi, ki, lens: (b_, h_, qi, 0)),
            scratch_shapes=[
                pltpu.VMEM((tq, 1), jnp.float32),   # running max m
                pltpu.VMEM((tq, 1), jnp.float32),   # running sum l
                pltpu.VMEM((tq, hd), jnp.float32),  # output accumulator
            ]),
        compiler_params=pltpu.CompilerParams(
            dimension_semantics=("parallel", "parallel", "parallel", "arbitrary"),
            vmem_limit_bytes=_VMEM_LIMIT),
        cost_estimate=pl.CostEstimate(
            flops=4 * B * n_head * T * T * hd,
            transcendentals=B * n_head * T * T,
            bytes_accessed=4 * B * T * C * 2),
    )(key_lens, q, k, v)

    # ---- 3) output projection (reduce over heads into an f32 accumulator) ----
    out = pl.pallas_call(
        _out_proj_kernel,
        out_shape=jax.ShapeDtypeStruct((B, T, C), x.dtype),
        grid=(B, T // tq, n_head),
        in_specs=[
            pl.BlockSpec((1, 1, tq, hd), lambda b_, t_, h_: (b_, h_, t_, 0)),
            pl.BlockSpec((1, hd, C), lambda b_, t_, h_: (h_, 0, 0)),
            pl.BlockSpec((1, C), lambda b_, t_, h_: (0, 0)),
        ],
        out_specs=pl.BlockSpec((1, tq, C), lambda b_, t_, h_: (b_, t_, 0)),
        scratch_shapes=[pltpu.VMEM((tq, C), jnp.float32)],
        compiler_params=pltpu.CompilerParams(
            dimension_semantics=("parallel", "parallel", "arbitrary"),
            vmem_limit_bytes=_VMEM_LIMIT),
        cost_estimate=pl.CostEstimate(
            flops=2 * B * T * C * C,
            transcendentals=0,
            bytes_accessed=B * T * C * 2 + C * C * 2 + C * 4 + B * T * C * 4),
    )(y, w_o, b_o)

    return out


# ----------------------------------- reference & test -----------------------------------
def _reference(x, pad_mask, w_attn, b_attn, w_proj, b_proj, n_head):
    """Pure-JAX f32 mirror of the PyTorch forward (non-LoRA, dropout=0)."""
    B, T, C = x.shape
    hd = C // n_head
    qkv = x @ w_attn + b_attn[None, None, :]                        # (B, T, 3C)
    q, k, v = jnp.split(qkv, 3, axis=2)
    q = q.reshape(B, T, n_head, hd).transpose(0, 2, 1, 3)           # (B, H, T, hd)
    k = k.reshape(B, T, n_head, hd).transpose(0, 2, 1, 3)
    v = v.reshape(B, T, n_head, hd).transpose(0, 2, 1, 3)
    att = (q @ k.transpose(0, 1, 3, 2)) / math.sqrt(hd)             # (B, H, T, T)
    causal = jnp.tril(jnp.ones((T, T), dtype=bool))
    keep = jnp.logical_and(causal[None, None], pad_mask[:, None] != 0.0)
    att = jnp.where(keep, att, jnp.finfo(jnp.float32).min)          # nan_to_num of -inf
    att = jax.nn.softmax(att, axis=-1)
    y = att @ v
    y = y.transpose(0, 2, 1, 3).reshape(B, T, C)
    return y @ w_proj + b_proj[None, None, :]


if __name__ == "__main__":
    # config (small demo; real configs should use C, hd as multiples of 128 for lane density)
    B, T = 2, 32
    n_embd, n_head = 32, 4
    # dropout = 0.0, block_size = T, lora_rank = 0 (standard path)

    key = jax.random.PRNGKey(0)
    kx, kw1, kb1, kw2, kb2 = jax.random.split(key, 5)

    x = jax.random.normal(kx, (B, T, n_embd), dtype=jnp.float32)

    # nn.Linear default init: U(-1/sqrt(fan_in), 1/sqrt(fan_in)); weights stored as (in, out).
    bound = 1.0 / math.sqrt(n_embd)
    w_attn = jax.random.uniform(kw1, (n_embd, 3 * n_embd), jnp.float32, -bound, bound)
    b_attn = jax.random.uniform(kb1, (3 * n_embd,), jnp.float32, -bound, bound)
    w_proj = jax.random.uniform(kw2, (n_embd, n_embd), jnp.float32, -bound, bound)
    b_proj = jax.random.uniform(kb2, (n_embd,), jnp.float32, -bound, bound)

    # pad_mask in the module's dense form: batch 0 fully valid, batch 1 valid for 20 keys.
    lens_true = jnp.array([T, 20], dtype=jnp.int32)
    col = jnp.arange(T)
    pad_mask = jnp.broadcast_to(
        (col[None, None, :] < lens_true[:, None, None]).astype(jnp.float32), (B, T, T))

    # kernel consumes per-batch key lengths (derived from the mask) instead of the dense mask
    key_lens = key_lengths_from_pad_mask(pad_mask)

    out = causal_self_attention(x, key_lens, w_attn, b_attn, w_proj, b_proj, n_head,
                                q_tile=16, kv_tile=16)
    out = jax.block_until_ready(out)

    ref = _reference(x, pad_mask, w_attn, b_attn, w_proj, b_proj, n_head)
    np.testing.assert_allclose(np.asarray(out), np.asarray(ref), rtol=2e-2, atol=2e-2)

    print("KERNEL_OK")
</pallas_src>

<mosaic_0001>
module attributes {stable_mosaic.version = 11 : i64} {
  func.func @_qkv_proj_kernel(%arg0: i32, %arg1: i32, %arg2: i32, %arg3: memref<1x16x32xf32, #tpu.memory_space<vmem>>, %arg4: memref<1x32x8xbf16, #tpu.memory_space<vmem>>, %arg5: memref<1x32x8xbf16, #tpu.memory_space<vmem>>, %arg6: memref<1x32x8xbf16, #tpu.memory_space<vmem>>, %arg7: memref<1x1x8xf32, #tpu.memory_space<vmem>>, %arg8: memref<1x1x8xf32, #tpu.memory_space<vmem>>, %arg9: memref<1x1x8xf32, #tpu.memory_space<vmem>>, %arg10: memref<1x1x16x8xbf16, #tpu.memory_space<vmem>>, %arg11: memref<1x1x16x8xbf16, #tpu.memory_space<vmem>>, %arg12: memref<1x1x16x8xbf16, #tpu.memory_space<vmem>>) attributes {dimension_semantics = [#tpu.dimension_semantics<parallel>, #tpu.dimension_semantics<parallel>, #tpu.dimension_semantics<parallel>], iteration_bounds = array<i64: 2, 2, 4>, scalar_prefetch = 0 : i64, scratch_operands = 0 : i64, tpu.core_type = #tpu.core_type<tc>, window_params = [{transform_indices = @transform_0, window_bounds = array<i64: 1, 16, 32>}, {transform_indices = @transform_1, window_bounds = array<i64: 1, 32, 8>}, {transform_indices = @transform_2, window_bounds = array<i64: 1, 32, 8>}, {transform_indices = @transform_3, window_bounds = array<i64: 1, 32, 8>}, {transform_indices = @transform_4, window_bounds = array<i64: 1, 1, 8>}, {transform_indices = @transform_5, window_bounds = array<i64: 1, 1, 8>}, {transform_indices = @transform_6, window_bounds = array<i64: 1, 1, 8>}, {transform_indices = @transform_7, window_bounds = array<i64: 1, 1, 16, 8>}, {transform_indices = @transform_8, window_bounds = array<i64: 1, 1, 16, 8>}, {transform_indices = @transform_9, window_bounds = array<i64: 1, 1, 16, 8>}]} {
    %c0 = arith.constant 0 : index
    %c0_0 = arith.constant 0 : index
    %c0_1 = arith.constant 0 : index
    %0 = vector.load %arg3[%c0, %c0_0, %c0_1] : memref<1x16x32xf32, #tpu.memory_space<vmem>>, vector<1x16x32xf32>
    %1 = vector.shape_cast %0 : vector<1x16x32xf32> to vector<16x32xf32>
    %2 = arith.truncf %1 : vector<16x32xf32> to vector<16x32xbf16>
    %c0_2 = arith.constant 0 : index
    %c0_3 = arith.constant 0 : index
    %c0_4 = arith.constant 0 : index
    %3 = vector.load %arg4[%c0_2, %c0_3, %c0_4] : memref<1x32x8xbf16, #tpu.memory_space<vmem>>, vector<1x32x8xbf16>
    %4 = vector.shape_cast %3 : vector<1x32x8xbf16> to vector<32x8xbf16>
    %cst = arith.constant dense<0.000000e+00> : vector<16x8xf32>
    %5 = tpu.matmul %2, %4, %cst {dimension_numbers = #tpu.dot_dimension_numbers<[1], [0], [0], [1], [0, 0, 1, 1], [], []>} : vector<16x32xbf16>, vector<32x8xbf16>, vector<16x8xf32> -> vector<16x8xf32>
    %c0_5 = arith.constant 0 : index
    %c0_6 = arith.constant 0 : index
    %c0_7 = arith.constant 0 : index
    %6 = vector.load %arg7[%c0_5, %c0_6, %c0_7] : memref<1x1x8xf32, #tpu.memory_space<vmem>>, vector<1x1x8xf32>
    %7 = vector.shape_cast %6 : vector<1x1x8xf32> to vector<1x8xf32>
    %8 = vector.broadcast %7 : vector<1x8xf32> to vector<16x8xf32>
    %9 = arith.addf %5, %8 : vector<16x8xf32>
    %10 = arith.truncf %9 : vector<16x8xf32> to vector<16x8xbf16>
    %c0_8 = arith.constant 0 : index
    %c0_9 = arith.constant 0 : index
    %c0_10 = arith.constant 0 : index
    %c0_11 = arith.constant 0 : index
    %11 = vector.load %arg10[%c0_8, %c0_9, %c0_10, %c0_11] : memref<1x1x16x8xbf16, #tpu.memory_space<vmem>>, vector<1x1x16x8xbf16>
    %12 = vector.shape_cast %11 : vector<1x1x16x8xbf16> to vector<16x8xbf16>
    %13 = vector.shape_cast %10 : vector<16x8xbf16> to vector<1x1x16x8xbf16>
    tpu.vector_store %arg10[%c0_8, %c0_9, %c0_10, %c0_11], %13 {strides = array<i32>} : memref<1x1x16x8xbf16, #tpu.memory_space<vmem>>, vector<1x1x16x8xbf16>,
    %c0_12 = arith.constant 0 : index
    %c0_13 = arith.constant 0 : index
    %c0_14 = arith.constant 0 : index
    %14 = vector.load %arg5[%c0_12, %c0_13, %c0_14] : memref<1x32x8xbf16, #tpu.memory_space<vmem>>, vector<1x32x8xbf16>
    %15 = vector.shape_cast %14 : vector<1x32x8xbf16> to vector<32x8xbf16>
    %cst_15 = arith.constant dense<0.000000e+00> : vector<16x8xf32>
    %16 = tpu.matmul %2, %15, %cst_15 {dimension_numbers = #tpu.dot_dimension_numbers<[1], [0], [0], [1], [0, 0, 1, 1], [], []>} : vector<16x32xbf16>, vector<32x8xbf16>, vector<16x8xf32> -> vector<16x8xf32>
    %c0_16 = arith.constant 0 : index
    %c0_17 = arith.constant 0 : index
    %c0_18 = arith.constant 0 : index
    %17 = vector.load %arg8[%c0_16, %c0_17, %c0_18] : memref<1x1x8xf32, #tpu.memory_space<vmem>>, vector<1x1x8xf32>
    %18 = vector.shape_cast %17 : vector<1x1x8xf32> to vector<1x8xf32>
    %19 = vector.broadcast %18 : vector<1x8xf32> to vector<16x8xf32>
    %20 = arith.addf %16, %19 : vector<16x8xf32>
    %21 = arith.truncf %20 : vector<16x8xf32> to vector<16x8xbf16>
    %c0_19 = arith.constant 0 : index
    %c0_20 = arith.constant 0 : index
    %c0_21 = arith.constant 0 : index
    %c0_22 = arith.constant 0 : index
    %22 = vector.load %arg11[%c0_19, %c0_20, %c0_21, %c0_22] : memref<1x1x16x8xbf16, #tpu.memory_space<vmem>>, vector<1x1x16x8xbf16>
    %23 = vector.shape_cast %22 : vector<1x1x16x8xbf16> to vector<16x8xbf16>
    %24 = vector.shape_cast %21 : vector<16x8xbf16> to vector<1x1x16x8xbf16>
    tpu.vector_store %arg11[%c0_19, %c0_20, %c0_21, %c0_22], %24 {strides = array<i32>} : memref<1x1x16x8xbf16, #tpu.memory_space<vmem>>, vector<1x1x16x8xbf16>,
    %c0_23 = arith.constant 0 : index
    %c0_24 = arith.constant 0 : index
    %c0_25 = arith.constant 0 : index
    %25 = vector.load %arg6[%c0_23, %c0_24, %c0_25] : memref<1x32x8xbf16, #tpu.memory_space<vmem>>, vector<1x32x8xbf16>
    %26 = vector.shape_cast %25 : vector<1x32x8xbf16> to vector<32x8xbf16>
    %cst_26 = arith.constant dense<0.000000e+00> : vector<16x8xf32>
    %27 = tpu.matmul %2, %26, %cst_26 {dimension_numbers = #tpu.dot_dimension_numbers<[1], [0], [0], [1], [0, 0, 1, 1], [], []>} : vector<16x32xbf16>, vector<32x8xbf16>, vector<16x8xf32> -> vector<16x8xf32>
    %c0_27 = arith.constant 0 : index
    %c0_28 = arith.constant 0 : index
    %c0_29 = arith.constant 0 : index
    %28 = vector.load %arg9[%c0_27, %c0_28, %c0_29] : memref<1x1x8xf32, #tpu.memory_space<vmem>>, vector<1x1x8xf32>
    %29 = vector.shape_cast %28 : vector<1x1x8xf32> to vector<1x8xf32>
    %30 = vector.broadcast %29 : vector<1x8xf32> to vector<16x8xf32>
    %31 = arith.addf %27, %30 : vector<16x8xf32>
    %32 = arith.truncf %31 : vector<16x8xf32> to vector<16x8xbf16>
    %c0_30 = arith.constant 0 : index
    %c0_31 = arith.constant 0 : index
    %c0_32 = arith.constant 0 : index
    %c0_33 = arith.constant 0 : index
    %33 = vector.load %arg12[%c0_30, %c0_31, %c0_32, %c0_33] : memref<1x1x16x8xbf16, #tpu.memory_space<vmem>>, vector<1x1x16x8xbf16>
    %34 = vector.shape_cast %33 : vector<1x1x16x8xbf16> to vector<16x8xbf16>
    %35 = vector.shape_cast %32 : vector<16x8xbf16> to vector<1x1x16x8xbf16>
    tpu.vector_store %arg12[%c0_30, %c0_31, %c0_32, %c0_33], %35 {strides = array<i32>} : memref<1x1x16x8xbf16, #tpu.memory_space<vmem>>, vector<1x1x16x8xbf16>,
    return
  }
  func.func @transform_0(%arg0: i32, %arg1: i32, %arg2: i32) -> (i32, i32, i32) {
    %c0_i32 = arith.constant 0 : i32
    %c0_i32_0 = arith.constant 0 : i32
    return %arg0, %arg1, %c0_i32 : i32, i32, i32
  }
  func.func @transform_1(%arg0: i32, %arg1: i32, %arg2: i32) -> (i32, i32, i32) {
    %c0_i32 = arith.constant 0 : i32
    %c0_i32_0 = arith.constant 0 : i32
    %c0_i32_1 = arith.constant 0 : i32
    return %arg2, %c0_i32, %c0_i32_0 : i32, i32, i32
  }
  func.func @transform_2(%arg0: i32, %arg1: i32, %arg2: i32) -> (i32, i32, i32) {
    %c0_i32 = arith.constant 0 : i32
    %c0_i32_0 = arith.constant 0 : i32
    %c0_i32_1 = arith.constant 0 : i32
    return %arg2, %c0_i32, %c0_i32_0 : i32, i32, i32
  }
  func.func @transform_3(%arg0: i32, %arg1: i32, %arg2: i32) -> (i32, i32, i32) {
    %c0_i32 = arith.constant 0 : i32
    %c0_i32_0 = arith.constant 0 : i32
    %c0_i32_1 = arith.constant 0 : i32
    return %arg2, %c0_i32, %c0_i32_0 : i32, i32, i32
  }
  func.func @transform_4(%arg0: i32, %arg1: i32, %arg2: i32) -> (i32, i32, i32) {
    %c0_i32 = arith.constant 0 : i32
    %c0_i32_0 = arith.constant 0 : i32
    %c0_i32_1 = arith.constant 0 : i32
    return %arg2, %c0_i32, %c0_i32_0 : i32, i32, i32
  }
  func.func @transform_5(%arg0: i32, %arg1: i32, %arg2: i32) -> (i32, i32, i32) {
    %c0_i32 = arith.constant 0 : i32
    %c0_i32_0 = arith.constant 0 : i32
    %c0_i32_1 = arith.constant 0 : i32
    return %arg2, %c0_i32, %c0_i32_0 : i32, i32, i32
  }
  func.func @transform_6(%arg0: i32, %arg1: i32, %arg2: i32) -> (i32, i32, i32) {
    %c0_i32 = arith.constant 0 : i32
    %c0_i32_0 = arith.constant 0 : i32
    %c0_i32_1 = arith.constant 0 : i32
    return %arg2, %c0_i32, %c0_i32_0 : i32, i32, i32
  }
  func.func @transform_7(%arg0: i32, %arg1: i32, %arg2: i32) -> (i32, i32, i32, i32) {
    %c0_i32 = arith.constant 0 : i32
    %c0_i32_0 = arith.constant 0 : i32
    return %arg0, %arg2, %arg1, %c0_i32 : i32, i32, i32, i32
  }
  func.func @transform_8(%arg0: i32, %arg1: i32, %arg2: i32) -> (i32, i32, i32, i32) {
    %c0_i32 = arith.constant 0 : i32
    %c0_i32_0 = arith.constant 0 : i32
    return %arg0, %arg2, %arg1, %c0_i32 : i32, i32, i32, i32
  }
  func.func @transform_9(%arg0: i32, %arg1: i32, %arg2: i32) -> (i32, i32, i32, i32) {
    %c0_i32 = arith.constant 0 : i32
    %c0_i32_0 = arith.constant 0 : i32
    return %arg0, %arg2, %arg1, %c0_i32 : i32, i32, i32, i32
  }
}

</mosaic_0001>

<bundles_post_ra>
// kernel: tpu_custom_call.1
= control target key start
LH: loop header
LB: loop body
LE: loop exit
PB: predicated region body
PF: predicated region fallthrough
CT: control target
= control target key end

     0   :  { %s1356_s30 = smov 0   ;;  %s1358_s10 = smov 0   ;;  %s1477_s0 = inlined_call_operand.vmem [shape: f32[2,32,32], index: 0, kind: input, shape index: {}]   ;;  %s1478_s1 = inlined_call_operand.vmem [shape: bf16[4,32,8], index: 1, kind: input, shape index: {}]   ;;  %s1479_s2 = inlined_call_operand.vmem [shape: bf16[4,32,8], index: 2, kind: input, shape index: {}]   ;;  %s1480_s3 = inlined_call_operand.vmem [shape: bf16[4,32,8], index: 3, kind: input, shape index: {}]   ;;  %s1481_s4 = inlined_call_operand.vmem [shape: f32[4,1,8], index: 4, kind: input, shape index: {}]   ;;  %s1482_s5 = inlined_call_operand.vmem [shape: f32[4,1,8], index: 5, kind: input, shape index: {}]   ;;  %s1483_s6 = inlined_call_operand.vmem [shape: f32[4,1,8], index: 6, kind: input, shape index: {}]   ;;  %s1484_s7 = inlined_call_operand.vmem [shape: bf16[2,4,32,8], index: 7, kind: output, shape index: {0}]   ;;  %s1485_s8 = inlined_call_operand.vmem [shape: bf16[2,4,32,8], index: 8, kind: output, shape index: {1}]   ;;  %s1486_s9 = inlined_call_operand.vmem [shape: bf16[2,4,32,8], index: 9, kind: output, shape index: {2}]  }
   0x1   :  { %1487 = sst [smem:[#allocation4_spill]] %s1478_s1  ;;  %s1360_s11 = smov 0  }
   0x2   :  { %1488 = sst [smem:[#allocation5_spill]] %s1479_s2  ;;  %s1362_s12 = smov 0  }
   0x3   :  { %s1364_s13 = smov 0   ;;  %s1366_s14 = smov 0  }
   0x4   :  { %s1368_s15 = smov 0  }
   0x5 LB: > { %s32_s16 = sadd.s32 1, %s1290_s12  ;;  %s35_s17 = sadd.s32 1, %s1294_s13  ;;  %s1302_s15 = sphi %s1368_s15, %s20_s15   ;;  %s1298_s14 = sphi %s1366_s14, %s1500_s14   ;;  %s1294_s13 = sphi %s1364_s13, %s1499_s13   ;;  %s1290_s12 = sphi %s1362_s12, %s1498_s12   ;;  %s1286_s11 = sphi %s1360_s11, %s1497_s11   ;;  %s1282_s10 = sphi %s1358_s10, %s1496_s10   ;;  %s1278_s30 = sphi %s1356_s30, %s1495_s30  }
   0x6   : > { %p33_p0 = scmp.ge.s32.totalorder %s32_s16, 4  ;;  %p1100_p1 = scmp.ge.s32.totalorder %s1302_s15, 1 }
   0x7   : > { %p384_p2 = scmp.lt.s32.totalorder %s1302_s15, 17  ;;  %s39_s18 = sadd.s32 1, %s1298_s14 }
   0x8   : > { %s1502_s16 = smov (%p33_p0, %s32_s16), 0  ;;  %s1504_s17 = smov (!%p33_p0, %s35_s17), %s1294_s13 }
   0x9   : > { %p385_p3 = pnand %p1100_p1, %p384_p2  ;;  %p37_p4 = scmp.ge.s32.totalorder %s1504_s17, 2 }
   0xa   : > { %p492_p6 = scmp.lt.s32.totalorder (!%p385_p3), %s1278_s30, 3  ;;  %s1101_s19 = sshll.u32 (!%p385_p3), %s1282_s10, 1 }
   0xb   : > { %s1506_s17 = smov (%p37_p4, %s1504_s17), 0  ;;  %s1508_s18 = smov (!%p37_p4, %s39_s18), %s1298_s14 }
   0xc   : > { %1489 = sst [smem:[#allocation2_spill]] %s1506_s17  ;;  %p41_p5 = scmp.ge.s32.totalorder %s1508_s18, 2 }
   0xd   : > { %388 = sbr.rel (%p385_p3) target bundleno = 241 (0xf1), region = 48  ;;  %p483_p7 = scmp.lt.s32.totalorder (!%p385_p3), %s1286_s11, 1 }
   0xe   : > { %s1510_s18 = smov (%p41_p5, %s1508_s18), 0  ;;  %p485_p8 = scmp.lt.s32.totalorder (!%p385_p3), %s1101_s19, 3 }
   0xf   : > { %1490 = sst [smem:[#allocation3_spill]] %s1510_s18 }
  0x10   : > { %s1491_s1 = sld [smem:[#allocation4_spill]] (!%p385_p3) }
  0x11   : > { %s1492_s2 = sld [smem:[#allocation5_spill]] (!%p385_p3) }
  0x12   : > { %v1304_v0 = vmov 0.0   ;;  %s1512_s30 = smov (!%p492_p6, %s1278_s30), 3  ;;  %vm1305_vm0 = vmmov 0   ;;  %s1514_s11 = smov (!%p483_p7, %s1286_s11), 1  ;;  %vm585_vm1 = vcmask 261120   ;;  %vm638_vm2 = vcmask 60416  }
  0x13   : > { %1160 = vmatprep.subr.bf16.mxu0 %v1304_v0  ;;  %1168 = vmatprep.subr.bf16.mxu1 %v1304_v0  ;;  %s1142_s20 = sshll.u32 %s1512_s30, 4  ;;  %s1102_s27 = sshll.u32 %s1514_s11, 2 }
  0x14   : > { %1164 = vmatprep.mubr.msk.bf16.mxu0 %vm1305_vm0, %v1304_v0  ;;  %1172 = vmatprep.mubr.msk.bf16.mxu1 %vm1305_vm0, %v1304_v0  ;;  %s1516_s19 = smov (!%p485_p8, %s1101_s19), 3  ;;  %s506_s10 = scalar_lea.vmem %s1480_s3, %s1142_s20 }
  0x15   : > { %s1111_s18 = sshll.u32 %s1512_s30, 2  ;;  %s488_s17 = sadd.s32 %s1102_s27, %s1516_s19  ;;  %v1246_v7 = vld [vmem:[%s506_s10 + $0x8] sm:$0xff]   ;;  %v1247_v9 = vld [vmem:[%s506_s10] sm:$0xff]  }
  0x16   : > { %s496_s23 = scalar_lea.vmem %s1491_s1, %s1142_s20  ;;  %s524_s21 = sadd.s32 %s1111_s18, %s1516_s19 }
  0x17   : > { %v1242_v1 = vld [vmem:[%s496_s23 + $0x8] sm:$0xff]   ;;  %s501_s26 = scalar_lea.vmem %s1492_s2, %s1142_s20  ;;  %v1244_v3 = vld [vmem:[%s496_s23] sm:$0xff]   ;;  %s1103_s22 = sshll.u32 %s488_s17, 3 }
  0x18   : > { %v1243_v2 = vld [vmem:[%s501_s26 + $0x8] sm:$0xff]   ;;  %1161 = vmatpush3.bf16.msra.mxu0 %v1242_v1  ;;  %v1245_v4 = vld [vmem:[%s501_s26] sm:$0xff]   ;;  %s490_s25 = scalar_lea.vmem %s1477_s0, %s1103_s22  ;;  %s1112_s2 = sshll.u32 %s1514_s11, 4 }
  0x19   : > { %1162 = vmatprep.subr.bf16.mxu0 %v1304_v0  ;;  %1169 = vmatpush3.bf16.msra.mxu1 %v1243_v2  ;;  %v559_v5 = vld [vmem:[%s490_s25] sm:$0xff]  ;;  %v560_v6 = vld [vmem:[%s490_s25 + $0x8] sm:$0xff]  ;;  %s526_s20 = sadd.s32 %s1112_s2, %s524_s21  ;;  %s509_s17 = scalar_lea.vmem %s1481_s4, %s1512_s30 }
  0x1a   : > { %1170 = vmatprep.subr.bf16.mxu1 %v1304_v0  ;;  %v561_v8 = vpack.c.bf16 %v560_v6, %v559_v5  ;;  %s512_s2 = scalar_lea.vmem %s1482_s5, %s1512_s30  ;;  %v1122_v10 = vld [vmem:[%s509_s17] ss:$0 sm:$0xff]  ;;  %s1432_s23 = sshll.u32 %s526_s20, 2 }
  0x1b   : > { %v1128_v11 = vld [vmem:[%s512_s2] ss:$0 sm:$0xff]  ;;  %s528_s28 = scalar_lea.vmem %s1484_s7, %s1432_s23  ;;  %s542_s21 = scalar_lea.vmem %s1485_s8, %s1432_s23 }
  0x1c   : > { %1163 = vmatpush3.bf16.msra.mxu0 %v1244_v3  ;;  %s515_s25 = scalar_lea.vmem %s1483_s6, %s1512_s30  ;;  %s556_s1 = scalar_lea.vmem %s1486_s9, %s1432_s23 }
  0x1d   : > { %1171 = vmatpush3.bf16.msra.mxu1 %v1245_v4  ;;  %1176 = vmatprep.subr.bf16.mxu0 %v1304_v0  ;;  %v1134_v25 = vld [vmem:[%s515_s25] ss:$0 sm:$0xff] }
  0x1f   : > { %1165 = vmatmul.mubr.msk.bf16.vlgmr.msra.gmra.mxu0 %vm585_vm1, %v561_v8 }
  0x20   : > { %1177 = vmatpush3.bf16.msra.mxu0 %v1246_v7  ;;  %1173 = vmatmul.mubr.msk.bf16.vlgmr.msra.gmra.mxu1 %vm585_vm1, %v561_v8 }
  0x21   : > { %1178 = vmatprep.subr.bf16.mxu0 %v1304_v0  ;;  %1180 = vmatprep.mubr.msk.bf16.mxu0 %vm1305_vm0, %v1304_v0 }
  0x24   : > { %1179 = vmatpush3.bf16.msra.mxu0 %v1247_v9 }
  0x27   : > { %1181 = vmatmul.mubr.msk.bf16.vlgmr.msra.gmra.mxu0 %vm585_vm1, %v561_v8 }
  0xdf   : > { %v623_v12 = vpop.f32.mrf.mxu0 }
  0xe0   : > { %v624_v13 = vadd.f32 %v1122_v10, %v623_v12  ;;  %v698_v14 = vpop.f32.mrf.mxu1 }
  0xe1   : > { %v1166_v15 = vpop.f32.mrf.mxu0  ;;  %v699_v16 = vadd.f32 %v1128_v11, %v698_v14 }
  0xe2   : > { %v1145_v17 = vpack.c.bf16 %v624_v13, %v624_v13  ;;  %v1174_v18 = vpop.f32.mrf.mxu1 }
  0xe3   : > { %v1147_v19 = vpack.c.bf16 %v699_v16, %v699_v16  ;;  %v626_v20 = vpop.f32.mrf.mxu0 }
  0xe4   : > { %639 = vst.msk [vmem:[%s528_s28] sm:$0xf] %vm638_vm2, %v1145_v17  ;;  %v627_v21 = vadd.f32 %v1122_v10, %v626_v20  ;;  %v701_v22 = vpop.f32.mrf.mxu1 }
  0xe5   : > { %713 = vst.msk [vmem:[%s542_s21] sm:$0xf] %vm638_vm2, %v1147_v19  ;;  %v1167_v23 = vpop.f32.mrf.mxu0  ;;  %v702_v24 = vadd.f32 %v1128_v11, %v701_v22 }
  0xe6   : > { %v1146_v26 = vpack.c.bf16 %v627_v21, %v627_v21  ;;  %v1175_v27 = vpop.f32.mrf.mxu1 }
  0xe7   : > { %v1148_v28 = vpack.c.bf16 %v702_v24, %v702_v24  ;;  %v772_v29 = vpop.f32.mrf.mxu0 }
  0xe8   : > { %640 = vst.msk [vmem:[%s528_s28 + $0x4] sm:$0xf] %vm638_vm2, %v1146_v26  ;;  %v773_v30 = vadd.f32 %v1134_v25, %v772_v29 }
  0xe9   : > { %714 = vst.msk [vmem:[%s542_s21 + $0x4] sm:$0xf] %vm638_vm2, %v1148_v28  ;;  %v1182_v31 = vpop.f32.mrf.mxu0 }
  0xea   : > { %v1149_v32 = vpack.c.bf16 %v773_v30, %v773_v30 }
  0xeb   : > { %v775_v33 = vpop.f32.mrf.mxu0 }
  0xec   : > { %787 = vst.msk [vmem:[%s556_s1] sm:$0xf] %vm638_vm2, %v1149_v32  ;;  %v776_v34 = vadd.f32 %v1134_v25, %v775_v33 }
  0xed   : > { %v1183_v35 = vpop.f32.mrf.mxu0 }
  0xee   : > { %v1150_v36 = vpack.c.bf16 %v776_v34, %v776_v34 }
  0xf0   : > { %788 = vst.msk [vmem:[%s556_s1 + $0x4] sm:$0xf] %vm638_vm2, %v1150_v36 }
  0xf1 PF: > { %s20_s15 = sadd.s32 1, %s1302_s15   ;;  %s1493_s17 = sld [smem:[#allocation2_spill]] }
  0xf2   : > { %p17_p9 = scmp.ge.s32.totalorder %s20_s15, 18   ;;  %s1494_s18 = sld [smem:[#allocation3_spill]] }
  0xf3   : > { %s1495_s30 = smov %s1290_s12  ;;  %s1496_s10 = smov %s1294_s13 }
  0xf4   : > { %s1497_s11 = smov %s1298_s14  ;;  %s1498_s12 = smov %s1502_s16 }
  0xf5   :  { %19 = sbr.rel (!%p17_p9) target bundleno = 5 (0x5), region = 120 }
  0xf7   : > { %s1499_s13 = smov %s1493_s17 }
  0xf8   : > { %s1500_s14 = smov %s1494_s18 }

</bundles_post_ra>
